<compile_context>
chip_gen: v7x
topology: tpu7x:2x2x1
jax: 0.10.0
libtpu: 0.0.40
codegen_flags: <defaults>
</compile_context>

<pallas_src>
import functools

import jax
import jax.numpy as jnp
from jax.experimental import pallas as pl
from jax.experimental.pallas import tpu as pltpu

_LANE = 128
_MIN_GRID_BLOCKS = 4  # aim for a multi-block grid (pipelining + both v7x TCs)

_K0 = 0x9E3779B9  # golden-ratio (seed, offset) premix
_K1 = 0x7FEB352D  # lowbias32 finalizer round 1
_K2 = 0x846CA68B  # lowbias32 finalizer round 2


def _round_up(a, b):
    return (a + b - 1) // b * b


def _mix(h):
    """lowbias32-style finalizer on uint32 (pure VPU integer ops)."""
    h = h ^ (h >> 16)
    h = h * jnp.uint32(_K1)
    h = h ^ (h >> 15)
    h = h * jnp.uint32(_K2)
    h = h ^ (h >> 16)
    return h


def _keep_from_offsets(offs_u32, seed, threshold):
    """keep[e] = hash(seed, offset e) (top 31 bits) >= round(p * 2^31)."""
    h = _mix(offs_u32 * jnp.uint32(_K0) + jnp.uint32(seed))
    return (h >> 1).astype(jnp.int32) >= jnp.int32(threshold)


def _dropout_kernel(x_ref, o_ref, *, seed, threshold, scale):
    """Seeded dropout on one (block_rows, 128) tile."""
    block_rows, lane = x_ref.shape
    blk = pl.program_id(0)

    # Scalar part of the hash, done on the scalar unit:
    #   c = block_base * K0 + seed   (mod 2^32)
    # Vector side then only needs `idx * K0 + c` before the finalizer, which is
    # bit-identical to hashing the absolute flat offset (base + idx).
    base = (blk * (block_rows * lane)).astype(jnp.uint32)
    c = base * jnp.uint32(_K0) + jnp.uint32(seed)

    # Per-element offset *within* the block (depends only on the block shape).
    row = jax.lax.broadcasted_iota(jnp.int32, (block_rows, lane), 0)
    col = jax.lax.broadcasted_iota(jnp.int32, (block_rows, lane), 1)
    idx = (row * lane + col).astype(jnp.uint32)

    h = _mix(idx * jnp.uint32(_K0) + c)
    # Top 31 bits -> uniform in [0, 2^31); signed integer threshold compare.
    keep = (h >> 1).astype(jnp.int32) >= jnp.int32(threshold)

    # Scale in f32 (parity with the fp32-scaling reference), cast at the store.
    x = x_ref[...].astype(jnp.float32)
    o_ref[...] = jnp.where(keep, x * jnp.float32(scale), 0.0).astype(o_ref.dtype)


def _select_tiling(itemsize):
    """Per-generation max block rows and scoped-VMEM override."""
    try:
        kind = jax.devices()[0].device_kind.lower()
    except Exception:  # pragma: no cover
        kind = ""
    if "v7" in kind or "7x" in kind:
        # v7x: only 64 MiB VMEM per TC -> ~4 MiB blocks, 48 MiB scoped limit.
        block_bytes, vmem_limit = 4 << 20, 48 << 20
    elif "v6" in kind or "v5" in kind:
        # v5e/v6e: 128 MiB physical VMEM.  ~4 MiB blocks amortize the ~0.35 us
        # per-step overhead to ~5-6% of DMA time while leaving headroom for the
        # hash-chain temporaries (which scale with block size); raise the
        # scoped limit above v5e's 16 MiB default.
        block_bytes, vmem_limit = 4 << 20, 64 << 20
    else:
        # Unknown chip: conservative defaults (no scoped-VMEM override).
        block_bytes, vmem_limit = 2 << 20, None
    max_rows = max(32, (block_bytes // (_LANE * itemsize)) // 32 * 32)
    return max_rows, vmem_limit


@functools.partial(jax.jit, static_argnames=("p", "seed"))
def efficient_memory_dropout(x, *, p, seed):
    """Forward of EfficientMemoryDropout in training mode."""
    p = float(p)
    if not (0.0 <= p < 1.0):
        raise ValueError(f"dropout p must be in [0, 1), got {p}")
    if p == 0.0:
        return x

    orig_shape = x.shape
    orig_dtype = x.dtype
    n = x.size
    if n == 0:
        return x
    if n >= (1 << 31):
        raise ValueError(
            "EfficientMemoryDropout uses 32-bit flat offsets; tensor has >= 2**31 elements"
        )

    seed32 = int(seed) & 0xFFFFFFFF
    threshold = min(int(round(p * (1 << 31))), (1 << 31) - 1)
    scale = 1.0 / (1.0 - p)
    itemsize = jnp.dtype(orig_dtype).itemsize

    flat = x.reshape(-1)
    rows = n // _LANE          # 128-aligned prefix handled by the kernel
    n_main = rows * _LANE
    tail = n - n_main          # < 128 ragged elements handled by plain jnp

    pieces = []

    if rows > 0:
        main = flat if tail == 0 else jax.lax.slice(flat, (0,), (n_main,))
        x2d = main.reshape(rows, _LANE)

        max_rows, vmem_limit = _select_tiling(itemsize)
        block_rows = min(
            max_rows, max(32, _round_up(pl.cdiv(rows, _MIN_GRID_BLOCKS), 32))
        )
        if block_rows >= rows:
            # Single block: make it exactly the array (always a legal block shape).
            block_rows = rows
        grid = (pl.cdiv(rows, block_rows),)

        kernel = functools.partial(
            _dropout_kernel, seed=seed32, threshold=threshold, scale=scale
        )

        out2d = pl.pallas_call(
            kernel,
            out_shape=jax.ShapeDtypeStruct((rows, _LANE), orig_dtype),
            grid=grid,
            in_specs=[pl.BlockSpec((block_rows, _LANE), lambda i: (i, 0))],
            out_specs=pl.BlockSpec((block_rows, _LANE), lambda i: (i, 0)),
            compiler_params=pltpu.CompilerParams(
                # Stateless per-element hash -> blocks independent; lets v7x
                # shard the grid across its two TensorCores.
                dimension_semantics=("parallel",),
                vmem_limit_bytes=vmem_limit,
            ),
            cost_estimate=pl.CostEstimate(
                flops=16 * n_main,
                transcendentals=0,
                bytes_accessed=2 * n_main * itemsize,
            ),
        )(x2d)
        pieces.append(out2d.reshape(-1))

    if tail > 0:
        offs = jnp.arange(tail, dtype=jnp.uint32) + jnp.uint32(n_main)
        keep = _keep_from_offsets(offs, seed32, threshold)
        tx = jax.lax.slice(flat, (n_main,), (n,)).astype(jnp.float32)
        pieces.append(jnp.where(keep, tx * scale, 0.0).astype(orig_dtype))

    out = pieces[0] if len(pieces) == 1 else jnp.concatenate(pieces)
    return out.reshape(orig_shape)


class EfficientMemoryDropoutJAX:
    """Minimal mirror of the PyTorch module (training-mode forward)."""

    def __init__(self, p, seed):
        self.p = float(p)
        self.seed = int(seed)  # deterministic, set in-script
        self.training = True

    def __call__(self, x):
        if self.training:
            return efficient_memory_dropout(x, p=self.p, seed=self.seed)
        return x


if __name__ == "__main__":
    key = jax.random.PRNGKey(0)
    # Small NCHW-like input consistent with typical use of the module.
    x = jax.random.normal(key, (2, 4, 16, 16), dtype=jnp.float32)

    p = 0.2
    scale = 1.0 / (1.0 - p)
    module = EfficientMemoryDropoutJAX(p=p, seed=1234)  # deterministic seed

    out = jax.block_until_ready(module(x))

    # Sanity: shape/dtype preserved, surviving elements scaled by 1/(1-p).
    assert out.shape == x.shape and out.dtype == x.dtype
    mask = out != 0.0
    ratio = jnp.where(mask, out / jnp.where(x == 0, 1.0, x), scale)
    assert jnp.allclose(ratio, scale, atol=1e-5)
    keep_frac = float(jnp.mean(mask.astype(jnp.float32)))
    assert 0.6 < keep_frac < 0.95  # roughly (1-p) kept

    # Seeded determinism: same seed -> identical mask/output.
    out2 = jax.block_until_ready(module(x))
    assert jnp.array_equal(out, out2)

    # Ragged sizes: tail-only (<128 elems) and aligned-prefix + tail paths.
    for shape in ((3, 5, 7), (8, 129)):
        xr = jax.random.normal(jax.random.PRNGKey(1), shape, dtype=jnp.float32)
        yr = jax.block_until_ready(module(xr))
        assert yr.shape == xr.shape and yr.dtype == xr.dtype
        target = xr * scale
        ok = (yr == 0.0) | (jnp.abs(yr - target) <= 1e-5 * jnp.abs(target) + 1e-6)
        assert bool(jnp.all(ok))

    print("KERNEL_OK")
</pallas_src>

<mosaic_0001>
module attributes {stable_mosaic.version = 11 : i64} {
  func.func @_dropout_kernel(%arg0: i32, %arg1: memref<16x128xf32, #tpu.memory_space<vmem>>, %arg2: memref<16x128xf32, #tpu.memory_space<vmem>>) attributes {dimension_semantics = [#tpu.dimension_semantics<parallel>], iteration_bounds = array<i64: 1>, scalar_prefetch = 0 : i64, scratch_operands = 0 : i64, tpu.core_type = #tpu.core_type<tc>, window_params = [{transform_indices = @transform_0, window_bounds = array<i64: 16, 128>}, {transform_indices = @transform_1, window_bounds = array<i64: 16, 128>}]} {
    %c2048_i32 = arith.constant 2048 : i32
    %0 = arith.muli %arg0, %c2048_i32 : i32
    %c-1640531527_i32 = arith.constant -1640531527 : i32
    %1 = arith.muli %0, %c-1640531527_i32 : i32
    %c1234_i32 = arith.constant 1234 : i32
    %2 = arith.addi %1, %c1234_i32 : i32
    %3 = tpu.iota {dimensions = array<i32: 0>} : vector<16x128xi32>
    %4 = tpu.iota {dimensions = array<i32: 1>} : vector<16x128xi32>
    %c128_i32 = arith.constant 128 : i32
    %5 = vector.broadcast %c128_i32 : i32 to vector<16x128xi32>
    %6 = arith.muli %3, %5 : vector<16x128xi32>
    %7 = arith.addi %6, %4 : vector<16x128xi32>
    %c-1640531527_i32_0 = arith.constant -1640531527 : i32
    %8 = vector.broadcast %c-1640531527_i32_0 : i32 to vector<16x128xi32>
    %9 = arith.muli %7, %8 : vector<16x128xi32>
    %10 = vector.broadcast %2 : i32 to vector<16x128xi32>
    %11 = arith.addi %9, %10 : vector<16x128xi32>
    %c16_i32 = arith.constant 16 : i32
    %12 = vector.broadcast %c16_i32 : i32 to vector<16x128xi32>
    %13 = arith.shrui %11, %12 : vector<16x128xi32>
    %14 = arith.xori %11, %13 : vector<16x128xi32>
    %c2146121005_i32 = arith.constant 2146121005 : i32
    %15 = vector.broadcast %c2146121005_i32 : i32 to vector<16x128xi32>
    %16 = arith.muli %14, %15 : vector<16x128xi32>
    %c15_i32 = arith.constant 15 : i32
    %17 = vector.broadcast %c15_i32 : i32 to vector<16x128xi32>
    %18 = arith.shrui %16, %17 : vector<16x128xi32>
    %19 = arith.xori %16, %18 : vector<16x128xi32>
    %c-2073254261_i32 = arith.constant -2073254261 : i32
    %20 = vector.broadcast %c-2073254261_i32 : i32 to vector<16x128xi32>
    %21 = arith.muli %19, %20 : vector<16x128xi32>
    %c16_i32_1 = arith.constant 16 : i32
    %22 = vector.broadcast %c16_i32_1 : i32 to vector<16x128xi32>
    %23 = arith.shrui %21, %22 : vector<16x128xi32>
    %24 = arith.xori %21, %23 : vector<16x128xi32>
    %c1_i32 = arith.constant 1 : i32
    %25 = vector.broadcast %c1_i32 : i32 to vector<16x128xi32>
    %26 = arith.shrui %24, %25 : vector<16x128xi32>
    %c429496730_i32 = arith.constant 429496730 : i32
    %27 = vector.broadcast %c429496730_i32 : i32 to vector<16x128xi32>
    %28 = arith.cmpi sge, %26, %27 : vector<16x128xi32>
    %c0 = arith.constant 0 : index
    %c0_2 = arith.constant 0 : index
    %29 = vector.load %arg1[%c0, %c0_2] : memref<16x128xf32, #tpu.memory_space<vmem>>, vector<16x128xf32>
    %cst = arith.constant 1.250000e+00 : f32
    %30 = vector.broadcast %cst : f32 to vector<16x128xf32>
    %31 = arith.mulf %29, %30 : vector<16x128xf32>
    %cst_3 = arith.constant 0.000000e+00 : f32
    %32 = vector.broadcast %cst_3 : f32 to vector<16x128xf32>
    %33 = arith.select %28, %31, %32 : vector<16x128xi1>, vector<16x128xf32>
    %c0_4 = arith.constant 0 : index
    %c0_5 = arith.constant 0 : index
    %34 = vector.load %arg2[%c0_4, %c0_5] : memref<16x128xf32, #tpu.memory_space<vmem>>, vector<16x128xf32>
    tpu.vector_store %arg2[%c0_4, %c0_5], %33 {strides = array<i32>} : memref<16x128xf32, #tpu.memory_space<vmem>>, vector<16x128xf32>,
    return
  }
  func.func @transform_0(%arg0: i32) -> (i32, i32) {
    %c0_i32 = arith.constant 0 : i32
    %c0_i32_0 = arith.constant 0 : i32
    return %arg0, %c0_i32 : i32, i32
  }
  func.func @transform_1(%arg0: i32) -> (i32, i32) {
    %c0_i32 = arith.constant 0 : i32
    %c0_i32_0 = arith.constant 0 : i32
    return %arg0, %c0_i32 : i32, i32
  }
}

</mosaic_0001>

<bundles_post_ra>
// kernel: efficient_memory_dropout.1
= control target key start
LH: loop header
LB: loop body
LE: loop exit
PB: predicated region body
PF: predicated region fallthrough
CT: control target
= control target key end

     0   :  { %v10_v0 = vlaneseq  ;;  %s78_s0 = inlined_call_operand.vmem [shape: f32[16,128], index: 0, kind: input, shape index: {}]   ;;  %s79_s1 = inlined_call_operand.vmem [shape: f32[16,128], index: 1, kind: output, shape index: {}]  }
   0x1   :  { %v44_v24 = vld [vmem:[%s78_s0] sm:$0xff]  ;;  %v45_v28 = vld [vmem:[%s78_s0 + $0x8] sm:$0xff] }
   0x2   :  { %v11_v1 = vshrl.u32 %v10_v0, 7  ;;  %v14_v2 = vand.u32 127, %v10_v0  ;;  %v46_v29 = vmul.f32 1.25, %v44_v24  ;;  %v47_v32 = vmul.f32 1.25, %v45_v28 }
   0x4   :  { %v15_v3 = vmul.u32 128, %v11_v1  ;;  %v12_v4 = vadd.s32 8, %v11_v1 }
   0x6   :  { %v17_v5 = vadd.s32 %v15_v3, %v14_v2  ;;  %v16_v6 = vmul.u32 128, %v12_v4 }
   0x8   :  { %v19_v7 = vmul.u32 2654435769, %v17_v5  ;;  %v18_v8 = vadd.s32 %v16_v6, %v14_v2 }
   0xa   :  { %v22_v9 = vadd.s32 1234, %v19_v7  ;;  %v20_v10 = vmul.u32 2654435769, %v18_v8 }
   0xc   :  { %v24_v11 = vshrl.u32 %v22_v9, 16  ;;  %v23_v12 = vadd.s32 1234, %v20_v10 }
   0xe   :  { %v26_v13 = vxor.u32 %v24_v11, %v22_v9  ;;  %v25_v14 = vshrl.u32 %v23_v12, 16 }
  0x10   :  { %v28_v15 = vmul.u32 2146121005, %v26_v13  ;;  %v27_v16 = vxor.u32 %v25_v14, %v23_v12 }
  0x12   :  { %v30_v17 = vshrl.u32 %v28_v15, 15  ;;  %v29_v18 = vmul.u32 2146121005, %v27_v16 }
  0x14   :  { %v32_v19 = vxor.u32 %v30_v17, %v28_v15  ;;  %v31_v20 = vshrl.u32 %v29_v18, 15 }
  0x16   :  { %v34_v21 = vmul.u32 2221713035, %v32_v19  ;;  %v33_v22 = vxor.u32 %v31_v20, %v29_v18 }
  0x18   :  { %v36_v23 = vshrl.u32 %v34_v21, 16  ;;  %v35_v25 = vmul.u32 2221713035, %v33_v22 }
  0x1a   :  { %v38_v26 = vxor.u32 %v36_v23, %v34_v21  ;;  %v37_v27 = vshrl.u32 %v35_v25, 16 }
  0x1c   :  { %v40_v30 = vshrl.u32 %v38_v26, 1  ;;  %v39_v31 = vxor.u32 %v37_v27, %v35_v25 }
  0x1e   :  { %vm42_vm0 = vcmp.ge.s32.totalorder %v40_v30, 429496730  ;;  %v41_v33 = vshrl.u32 %v39_v31, 1 }
  0x1f   :  { %v48_v34 = vsel %vm42_vm0, %v46_v29, 0.0 }
  0x20   :  { %50 = vst [vmem:[%s79_s1] sm:$0xff] %v48_v34  ;;  %vm43_vm1 = vcmp.ge.s32.totalorder %v41_v33, 429496730 }
  0x21   :  { %v49_v35 = vsel %vm43_vm1, %v47_v32, 0.0 }
  0x22   :  { %51 = vst [vmem:[%s79_s1 + $0x8] sm:$0xff] %v49_v35 }

</bundles_post_ra>
